<compile_context>
chip_gen: v7x
topology: tpu7x:2x2x1
jax: 0.10.0
libtpu: 0.0.40
codegen_flags: <defaults>
</compile_context>

<pallas_src>
import jax
import jax.numpy as jnp
from jax.experimental import pallas as pl
from jax.experimental.pallas import tpu as pltpu


def _identity_dma_kernel(feats_in, coors_in, feats_out, coors_out, sems):
    # Direct HBM->HBM DMA for each array: start both, then wait on both so the
    # two transfers overlap on the DMA engines.  No VMEM round-trip, no grid.
    cp_feats = pltpu.make_async_copy(feats_in, feats_out, sems.at[0])
    cp_coors = pltpu.make_async_copy(coors_in, coors_out, sems.at[1])
    cp_feats.start()
    cp_coors.start()
    cp_feats.wait()
    cp_coors.wait()


def _fused_identity_copy(voxel_feats, voxel_coors):
    """Explicit materialized copy of both tensors via ONE fused pallas_call
    that does raw HBM->HBM DMA (no VMEM staging, no padding, no grid)."""
    return pl.pallas_call(
        _identity_dma_kernel,
        out_shape=(
            jax.ShapeDtypeStruct(voxel_feats.shape, voxel_feats.dtype),
            jax.ShapeDtypeStruct(voxel_coors.shape, voxel_coors.dtype),
        ),
        in_specs=[
            pl.BlockSpec(memory_space=pl.ANY),
            pl.BlockSpec(memory_space=pl.ANY),
        ],
        out_specs=(
            pl.BlockSpec(memory_space=pl.ANY),
            pl.BlockSpec(memory_space=pl.ANY),
        ),
        scratch_shapes=[pltpu.SemaphoreType.DMA((2,))],
    )(voxel_feats, voxel_coors)


class IdentityMiddleEncoder:
    """JAX/Pallas port of mmdet3d IdentityMiddleEncoder (no parameters)."""

    def __init__(self):
        # Module has no weights; nothing to initialize.
        pass

    def __call__(self, voxel_feats, voxel_coors, batch_size, materialize=False):
        if not materialize:
            # Architecturally correct path: the module does zero compute, so
            # return the inputs unchanged (no kernel launch, no copy).
            return (voxel_feats, voxel_coors, batch_size)
        # Guard: empty voxel set (N == 0) — DMA of a zero-sized ref buys
        # nothing; identity semantics allow returning the inputs directly.
        if voxel_feats.size == 0 or voxel_coors.size == 0:
            return (voxel_feats, voxel_coors, batch_size)
        # Optional explicit copy: single fused HBM->HBM DMA Pallas kernel.
        out_feats, out_coors = _fused_identity_copy(voxel_feats, voxel_coors)
        return (out_feats, out_coors, batch_size)


if __name__ == "__main__":
    key = jax.random.PRNGKey(0)
    kf, kc = jax.random.split(key)

    num_voxels = 64   # small synthetic voxel count
    feat_dim = 32     # per-voxel feature dim
    batch_size = 2

    voxel_feats = jax.random.normal(kf, (num_voxels, feat_dim), dtype=jnp.float32)
    # coors: (batch_idx, z, y, x) int32
    voxel_coors = jax.random.randint(
        kc, (num_voxels, 4), minval=0, maxval=16, dtype=jnp.int32
    )
    voxel_coors = voxel_coors.at[:, 0].set(
        jnp.arange(num_voxels, dtype=jnp.int32) % batch_size
    )

    encoder = IdentityMiddleEncoder()

    # Default (recommended) path: pure pass-through, no kernels.
    pf, pc, pb = encoder(voxel_feats, voxel_coors, batch_size)
    assert pf is voxel_feats and pc is voxel_coors and pb == batch_size

    # Explicit-copy path: exercises the fused HBM->HBM DMA identity kernel.
    out_feats, out_coors, out_bs = encoder(
        voxel_feats, voxel_coors, batch_size, materialize=True
    )
    out_feats = jax.block_until_ready(out_feats)
    out_coors = jax.block_until_ready(out_coors)

    assert out_feats.shape == voxel_feats.shape and out_feats.dtype == voxel_feats.dtype
    assert out_coors.shape == voxel_coors.shape and out_coors.dtype == voxel_coors.dtype
    assert out_bs == batch_size
    assert bool(jnp.all(out_feats == voxel_feats))
    assert bool(jnp.all(out_coors == voxel_coors))

    # Empty-input guard path (N == 0 voxels) must not launch a kernel.
    empty_feats = jnp.zeros((0, feat_dim), jnp.float32)
    empty_coors = jnp.zeros((0, 4), jnp.int32)
    ef, ec, eb = encoder(empty_feats, empty_coors, batch_size, materialize=True)
    assert ef.shape == (0, feat_dim) and ec.shape == (0, 4) and eb == batch_size

    print("KERNEL_OK")
</pallas_src>

<mosaic_0001>
module attributes {stable_mosaic.version = 11 : i64} {
  func.func @_identity_dma_kernel(%arg0: memref<64x32xf32, #tpu.memory_space<any>>, %arg1: memref<64x4xi32, #tpu.memory_space<any>>, %arg2: memref<64x32xf32, #tpu.memory_space<any>>, %arg3: memref<64x4xi32, #tpu.memory_space<any>>, %arg4: memref<2x!tpu.dma_semaphore, #tpu.memory_space<semaphore_mem>>) attributes {dimension_semantics = [], scalar_prefetch = 0 : i64, scratch_operands = 1 : i64, tpu.core_type = #tpu.core_type<tc>} {
    %c0_i32 = arith.constant 0 : i32
    %0 = tpu.memref_slice %arg4[%c0_i32] : memref<2x!tpu.dma_semaphore, #tpu.memory_space<semaphore_mem>> -> memref<1x!tpu.dma_semaphore, #tpu.memory_space<semaphore_mem>>
    %1 = tpu.memref_squeeze %0 : memref<1x!tpu.dma_semaphore, #tpu.memory_space<semaphore_mem>> -> memref<!tpu.dma_semaphore, #tpu.memory_space<semaphore_mem>>
    tpu.enqueue_dma source(%arg0 : memref<64x32xf32, #tpu.memory_space<any>>) target(%arg2 : memref<64x32xf32, #tpu.memory_space<any>>) target_semaphore(%1 : memref<!tpu.dma_semaphore, #tpu.memory_space<semaphore_mem>>)
    %c1_i32 = arith.constant 1 : i32
    %2 = tpu.memref_slice %arg4[%c1_i32] : memref<2x!tpu.dma_semaphore, #tpu.memory_space<semaphore_mem>> -> memref<1x!tpu.dma_semaphore, #tpu.memory_space<semaphore_mem>>
    %3 = tpu.memref_squeeze %2 : memref<1x!tpu.dma_semaphore, #tpu.memory_space<semaphore_mem>> -> memref<!tpu.dma_semaphore, #tpu.memory_space<semaphore_mem>>
    tpu.enqueue_dma source(%arg1 : memref<64x4xi32, #tpu.memory_space<any>>) target(%arg3 : memref<64x4xi32, #tpu.memory_space<any>>) target_semaphore(%3 : memref<!tpu.dma_semaphore, #tpu.memory_space<semaphore_mem>>)
    %c0_i32_0 = arith.constant 0 : i32
    %4 = tpu.memref_slice %arg4[%c0_i32_0] : memref<2x!tpu.dma_semaphore, #tpu.memory_space<semaphore_mem>> -> memref<1x!tpu.dma_semaphore, #tpu.memory_space<semaphore_mem>>
    %5 = tpu.memref_squeeze %4 : memref<1x!tpu.dma_semaphore, #tpu.memory_space<semaphore_mem>> -> memref<!tpu.dma_semaphore, #tpu.memory_space<semaphore_mem>>
    tpu.wait_dma2 semaphore(%5 : memref<!tpu.dma_semaphore, #tpu.memory_space<semaphore_mem>>) src(%arg0 : memref<64x32xf32, #tpu.memory_space<any>>) dst(%arg2 : memref<64x32xf32, #tpu.memory_space<any>>)
    %c1_i32_1 = arith.constant 1 : i32
    %6 = tpu.memref_slice %arg4[%c1_i32_1] : memref<2x!tpu.dma_semaphore, #tpu.memory_space<semaphore_mem>> -> memref<1x!tpu.dma_semaphore, #tpu.memory_space<semaphore_mem>>
    %7 = tpu.memref_squeeze %6 : memref<1x!tpu.dma_semaphore, #tpu.memory_space<semaphore_mem>> -> memref<!tpu.dma_semaphore, #tpu.memory_space<semaphore_mem>>
    tpu.wait_dma2 semaphore(%7 : memref<!tpu.dma_semaphore, #tpu.memory_space<semaphore_mem>>) src(%arg1 : memref<64x4xi32, #tpu.memory_space<any>>) dst(%arg3 : memref<64x4xi32, #tpu.memory_space<any>>)
    return
  }
}

</mosaic_0001>

<bundles_post_ra>
// kernel: tpu_custom_call.1
= control target key start
LH: loop header
LB: loop body
LE: loop exit
PB: predicated region body
PF: predicated region fallthrough
CT: control target
= control target key end

     0   :  { %s278_s0 = inlined_call_operand.vmem [shape: f32[64,32], index: 0, kind: input, shape index: {}]   ;;  %s279_s1 = inlined_call_operand.vmem [shape: s32[64,4], index: 1, kind: input, shape index: {}]   ;;  %s280_s2 = inlined_call_operand.vmem [shape: f32[64,32], index: 2, kind: output, shape index: {0}]   ;;  %s281_s3 = inlined_call_operand.vmem [shape: s32[64,4], index: 3, kind: output, shape index: {1}]  }
   0x1   :  { %v41_v0 = vld [vmem:[%s278_s0] sm:$0xff]  ;;  %v43_v1 = vld [vmem:[%s278_s0 + $0x8] sm:$0xff]  ;;  %v45_v2 = vld [vmem:[%s278_s0 + $0x10] sm:$0xff] }
   0x2   :  { %42 = vst [vmem:[%s280_s2] sm:$0xff] %v41_v0  ;;  %44 = vst [vmem:[%s280_s2 + $0x8] sm:$0xff] %v43_v1  ;;  %v47_v3 = vld [vmem:[%s278_s0 + $0x18] sm:$0xff]  ;;  %v49_v4 = vld [vmem:[%s278_s0 + $0x20] sm:$0xff] }
   0x3   :  { %46 = vst [vmem:[%s280_s2 + $0x10] sm:$0xff] %v45_v2  ;;  %v51_v5 = vld [vmem:[%s278_s0 + $0x28] sm:$0xff]  ;;  %48 = vst [vmem:[%s280_s2 + $0x18] sm:$0xff] %v47_v3  ;;  %v53_v6 = vld [vmem:[%s278_s0 + $0x30] sm:$0xff] }
   0x4   :  { %50 = vst [vmem:[%s280_s2 + $0x20] sm:$0xff] %v49_v4  ;;  %52 = vst [vmem:[%s280_s2 + $0x28] sm:$0xff] %v51_v5  ;;  %v55_v7 = vld [vmem:[%s278_s0 + $0x38] sm:$0xff] }
   0x5   :  { %54 = vst [vmem:[%s280_s2 + $0x30] sm:$0xff] %v53_v6  ;;  %56 = vst [vmem:[%s280_s2 + $0x38] sm:$0xff] %v55_v7 }
   0x6   :  { %64 = vsyncadd [#allocation2], 1024  ;;  %v98_v8 = vld [vmem:[%s279_s1] sm:$0xff]  ;;  %v100_v9 = vld [vmem:[%s279_s1 + $0x8] sm:$0xff] }
   0x7   :  { %99 = vst [vmem:[%s281_s3] sm:$0xff] %v98_v8  ;;  %101 = vst [vmem:[%s281_s3 + $0x8] sm:$0xff] %v100_v9  ;;  %v102_v10 = vld [vmem:[%s279_s1 + $0x10] sm:$0xff]  ;;  %v104_v11 = vld [vmem:[%s279_s1 + $0x18] sm:$0xff] }
   0x8   :  { %v106_v12 = vld [vmem:[%s279_s1 + $0x20] sm:$0xff]  ;;  %103 = vst [vmem:[%s281_s3 + $0x10] sm:$0xff] %v102_v10  ;;  %105 = vst [vmem:[%s281_s3 + $0x18] sm:$0xff] %v104_v11  ;;  %v108_v13 = vld [vmem:[%s279_s1 + $0x28] sm:$0xff] }
   0x9   :  { %107 = vst [vmem:[%s281_s3 + $0x20] sm:$0xff] %v106_v12  ;;  %v110_v14 = vld [vmem:[%s279_s1 + $0x30] sm:$0xff]  ;;  %v112_v15 = vld [vmem:[%s279_s1 + $0x38] sm:$0xff]  ;;  %109 = vst [vmem:[%s281_s3 + $0x28] sm:$0xff] %v108_v13 }
   0xa   :  { %111 = vst [vmem:[%s281_s3 + $0x30] sm:$0xff] %v110_v14  ;;  %113 = vst [vmem:[%s281_s3 + $0x38] sm:$0xff] %v112_v15 }
   0xb   :  { %121 = vsyncadd [#allocation2 + $0x1], 1024 }
   0xc   :  { %158 = dma.done.wait [#allocation2], 1024 }
   0xd   :  { %159 = vsyncadd [#allocation2], 4294966272 }
   0xe   :  { %160 = dma.done.wait [#allocation2 + $0x1], 1024 }
   0xf   :  { %161 = vsyncadd [#allocation2 + $0x1], 4294966272 }
  0x10   :  { %127 = vsyncmov [#allocation2] }
  0x13   :  { %s128_s20 = vpop.sfrf %127 }
  0x14   :  { %p156_p0 = scmp.ne.s32.totalorder %s128_s20, 0 }
  0x16   :  { %132 = shalt.err (%p156_p0)  }
  0x17   :  { %134 = vsyncmov [#allocation2 + $0x1] }
  0x1a   :  { %s135_s1 = vpop.sfrf %134 }
  0x1b   :  { %p157_p1 = scmp.ne.s32.totalorder %s135_s1, 0 }
  0x1d   :  { %139 = shalt.err (%p157_p1)  }

</bundles_post_ra>
